<compile_context>
chip_gen: v7x
topology: tpu7x:2x2x1
jax: 0.10.0
libtpu: 0.0.40
codegen_flags: <defaults>
</compile_context>

<pallas_src>
import jax
import jax.numpy as jnp
from jax import lax
from jax.experimental import pallas as pl
from jax.experimental.pallas import tpu as pltpu


def _out_sizes(spatial, ker_shape, stride):
    return tuple((d - k) // stride + 1 for d, k in zip(spatial, ker_shape))


def _round_up(a, b):
    return ((a + b - 1) // b) * b


def _tree_max(parts):
    # Pairwise (tree) reduction keeps the dependent VALU chain short.
    parts = list(parts)
    while len(parts) > 1:
        nxt = [jnp.maximum(parts[i], parts[i + 1])
               for i in range(0, len(parts) - 1, 2)]
        if len(parts) % 2:
            nxt.append(parts[-1])
        parts = nxt
    return parts[0]


def _make_kernel(ker_shape, out_spatial, t0, static_unroll_limit=32):
    k0, k1, k2, k3 = ker_shape
    O0, O1, O2, O3 = out_spatial

    def _pool_inner(slab):
        # slab: (cblk, T1, T2b, D4) -> (cblk, O1, O2, O3)
        # Leading (cheap) axis first; the lane axis (D4) last, on the
        # already-shrunken intermediate.
        a = _tree_max([slab[:, j:j + O1] for j in range(k1)])
        b = _tree_max([a[:, :, j:j + O2] for j in range(k2)])
        return _tree_max([b[:, :, :, j:j + O3] for j in range(k3)])

    if t0 <= static_unroll_limit:
        # Fully unrolled at trace time: all indices/conditions are static, so
        # there is no predication and the scheduler sees the whole loop.
        def kernel(x_ref, o_ref):
            # x_ref: (cblk, T0, T1, T2b, D4); o_ref: (cblk, O0, O1, O2, O3)
            for i in range(t0):
                pooled = _pool_inner(x_ref[:, i, :, :, :])
                for j0 in range(k0):
                    o = i - j0
                    if 0 <= o < O0:
                        if j0 == 0:   # first contribution -> init
                            o_ref[:, o, :, :, :] = pooled
                        else:         # later contributions -> accumulate
                            o_ref[:, o, :, :, :] = jnp.maximum(
                                o_ref[:, o, :, :, :], pooled)
    else:
        # Large-D1 fallback: fori_loop (unrolled for scheduler visibility)
        # with the same "pool each slab once, accumulate into o_ref" scheme.
        def kernel(x_ref, o_ref):
            dt = o_ref.dtype
            if jnp.issubdtype(dt, jnp.floating):
                neg = jnp.array(-jnp.inf, dtype=dt)
            else:
                neg = jnp.array(jnp.iinfo(dt).min, dtype=dt)
            o_ref[...] = jnp.full(o_ref.shape, neg, dtype=dt)

            def body(i, carry):
                slab = x_ref[:, pl.ds(i, 1), :, :, :][:, 0]
                pooled = _pool_inner(slab)[:, None]
                for j0 in range(k0):
                    o = i - j0

                    @pl.when(jnp.logical_and(o >= 0, o < O0))
                    def _():
                        cur = o_ref[:, pl.ds(o, 1), :, :, :]
                        o_ref[:, pl.ds(o, 1), :, :, :] = jnp.maximum(cur, pooled)
                return carry

            lax.fori_loop(0, t0, body, 0, unroll=4)

    return kernel


def _vmem_capacity_bytes():
    try:
        return int(pltpu.get_tpu_info().vmem_capacity_bytes)
    except Exception:
        return 64 * 1024 * 1024   # conservative (v7x-sized) fallback


def _pick_cblk(C, per_channel_bytes, budget_bytes, N, min_grid_steps=2):
    divisors = [d for d in range(C, 0, -1) if C % d == 0]
    cblk = 1
    for d in divisors:
        if per_channel_bytes * d <= budget_bytes:
            cblk = d
            break
    # v7x has 2 TensorCores per chip: keep at least 2 parallel grid steps.
    while N * (C // cblk) < min_grid_steps:
        smaller = [d for d in divisors if d < cblk]
        if not smaller:
            break
        cblk = smaller[0]
    return cblk


def maxpool4d(x, ker_shape, stride):
    """Pallas TPU implementation of MaxPool4d.forward."""
    N, C, D1, D2, D3, D4 = x.shape
    k0, k1, k2, k3 = ker_shape
    O0, O1, O2, O3 = _out_sizes((D1, D2, D3, D4), ker_shape, stride)

    # The reference only ever reads indices 0..Oi+ki-2 along each spatial dim.
    T0, T1, T2 = O0 + k0 - 1, O1 + k1 - 1, O2 + k2 - 1
    # D3 is the sublane axis of the block: multiple of 8 or the full dim.
    T2b = min(D3, _round_up(T2, 8))
    # D4 is the lane axis: keep it full (128-divisibility escape hatch).

    itemsize = jnp.dtype(x.dtype).itemsize
    in_block = T0 * T1 * T2b * D4
    out_block = O0 * O1 * O2 * O3
    slab = T1 * T2b * D4
    # Double-buffered in/out blocks + in-kernel slice temporaries (slices
    # materialize; the per-slab intermediates are bounded by ~3 slab volumes).
    per_channel = (2 * in_block + 2 * out_block + 3 * slab) * itemsize

    capacity = _vmem_capacity_bytes()
    budget = capacity // 2                       # headroom for compiler scratch
    cblk = _pick_cblk(C, per_channel, budget, N)
    need = per_channel * cblk
    vmem_limit = int(min(max(capacity - (4 << 20), 32 << 20),
                         max(2 * need, 32 << 20)))
    # TODO(synk): for volumes where even cblk=1 exceeds the budget, add a
    # D1-chunk grid axis (pl.Element halo or manual double-buffered DMA).

    kernel = _make_kernel((k0, k1, k2, k3), (O0, O1, O2, O3), T0)

    return pl.pallas_call(
        kernel,
        out_shape=jax.ShapeDtypeStruct((N, C, O0, O1, O2, O3), x.dtype),
        grid_spec=pltpu.PrefetchScalarGridSpec(
            num_scalar_prefetch=0,
            grid=(N, C // cblk),
            in_specs=[
                pl.BlockSpec(
                    (pl.Squeezed(), cblk, T0, T1, T2b, D4),
                    lambda n, c: (n, c, 0, 0, 0, 0),
                ),
            ],
            out_specs=pl.BlockSpec(
                (pl.Squeezed(), cblk, O0, O1, O2, O3),
                lambda n, c: (n, c, 0, 0, 0, 0),
            ),
        ),
        compiler_params=pltpu.CompilerParams(
            dimension_semantics=("parallel", "parallel"),
            vmem_limit_bytes=vmem_limit,
        ),
    )(x)


def maxpool4d_ref(x, ker_shape, stride):
    """Pure-JAX reference reproducing the as_strided + amax semantics."""
    N, C, D1, D2, D3, D4 = x.shape
    k0, k1, k2, k3 = ker_shape
    O0, O1, O2, O3 = _out_sizes((D1, D2, D3, D4), ker_shape, stride)
    acc = None
    for j0 in range(k0):
        for j1 in range(k1):
            for j2 in range(k2):
                for j3 in range(k3):
                    win = x[:, :, j0:j0 + O0, j1:j1 + O1,
                            j2:j2 + O2, j3:j3 + O3]
                    acc = win if acc is None else jnp.maximum(acc, win)
    return acc


if __name__ == "__main__":
    # x: (N=2, C=4, 6, 6, 6, 6), kernel (2,2,2,2), stride 2 -> out (2,4,3,3,3,3)
    key = jax.random.PRNGKey(0)
    N, C = 2, 4
    spatial = (6, 6, 6, 6)
    ker_shape = (2, 2, 2, 2)
    stride = 2

    x = jax.random.normal(key, (N, C) + spatial, dtype=jnp.float32)

    out = maxpool4d(x, ker_shape, stride)
    out = jax.block_until_ready(out)

    ref = maxpool4d_ref(x, ker_shape, stride)
    assert out.shape == ref.shape, (out.shape, ref.shape)
    assert jnp.array_equal(out, ref), "Pallas MaxPool4d mismatch vs reference"

    print("KERNEL_OK")
</pallas_src>

<mosaic_0001>
module attributes {stable_mosaic.version = 11 : i64} {
  func.func @kernel(%arg0: i32, %arg1: i32, %arg2: memref<1x4x4x4x6x6xf32, #tpu.memory_space<vmem>>, %arg3: memref<1x4x3x3x3x3xf32, #tpu.memory_space<vmem>>) attributes {dimension_semantics = [#tpu.dimension_semantics<parallel>, #tpu.dimension_semantics<parallel>], iteration_bounds = array<i64: 2, 1>, scalar_prefetch = 0 : i64, scratch_operands = 0 : i64, tpu.core_type = #tpu.core_type<tc>, window_params = [{transform_indices = @transform_0, window_bounds = array<i64: 1, 4, 4, 4, 6, 6>}, {transform_indices = @transform_1, window_bounds = array<i64: 1, 4, 3, 3, 3, 3>}]} {
    %c0 = arith.constant 0 : index
    %c0_0 = arith.constant 0 : index
    %c0_1 = arith.constant 0 : index
    %c0_2 = arith.constant 0 : index
    %c0_3 = arith.constant 0 : index
    %c0_4 = arith.constant 0 : index
    %0 = vector.load %arg2[%c0, %c0_0, %c0_1, %c0_2, %c0_3, %c0_4] : memref<1x4x4x4x6x6xf32, #tpu.memory_space<vmem>>, vector<1x4x1x4x6x6xf32>
    %1 = vector.shape_cast %0 : vector<1x4x1x4x6x6xf32> to vector<4x4x6x6xf32>
    %2 = vector.extract_strided_slice %1 {offsets = [0, 0, 0, 0], sizes = [4, 3, 6, 6], strides = [1, 1, 1, 1]} : vector<4x4x6x6xf32> to vector<4x3x6x6xf32>
    %3 = vector.extract_strided_slice %1 {offsets = [0, 1, 0, 0], sizes = [4, 3, 6, 6], strides = [1, 1, 1, 1]} : vector<4x4x6x6xf32> to vector<4x3x6x6xf32>
    %4 = arith.maximumf %2, %3 : vector<4x3x6x6xf32>
    %5 = vector.extract_strided_slice %4 {offsets = [0, 0, 0, 0], sizes = [4, 3, 3, 6], strides = [1, 1, 1, 1]} : vector<4x3x6x6xf32> to vector<4x3x3x6xf32>
    %6 = vector.extract_strided_slice %4 {offsets = [0, 0, 1, 0], sizes = [4, 3, 3, 6], strides = [1, 1, 1, 1]} : vector<4x3x6x6xf32> to vector<4x3x3x6xf32>
    %7 = arith.maximumf %5, %6 : vector<4x3x3x6xf32>
    %8 = vector.extract_strided_slice %7 {offsets = [0, 0, 0, 0], sizes = [4, 3, 3, 3], strides = [1, 1, 1, 1]} : vector<4x3x3x6xf32> to vector<4x3x3x3xf32>
    %9 = vector.extract_strided_slice %7 {offsets = [0, 0, 0, 1], sizes = [4, 3, 3, 3], strides = [1, 1, 1, 1]} : vector<4x3x3x6xf32> to vector<4x3x3x3xf32>
    %10 = arith.maximumf %8, %9 : vector<4x3x3x3xf32>
    %c0_5 = arith.constant 0 : index
    %c0_6 = arith.constant 0 : index
    %c0_7 = arith.constant 0 : index
    %c0_8 = arith.constant 0 : index
    %c0_9 = arith.constant 0 : index
    %c0_10 = arith.constant 0 : index
    %11 = vector.load %arg3[%c0_5, %c0_6, %c0_7, %c0_8, %c0_9, %c0_10] : memref<1x4x3x3x3x3xf32, #tpu.memory_space<vmem>>, vector<1x4x1x3x3x3xf32>
    %12 = vector.shape_cast %11 : vector<1x4x1x3x3x3xf32> to vector<4x3x3x3xf32>
    %13 = vector.shape_cast %10 : vector<4x3x3x3xf32> to vector<1x4x1x3x3x3xf32>
    tpu.vector_store %arg3[%c0_5, %c0_6, %c0_7, %c0_8, %c0_9, %c0_10], %13 {strides = array<i32>} : memref<1x4x3x3x3x3xf32, #tpu.memory_space<vmem>>, vector<1x4x1x3x3x3xf32>,
    %c0_11 = arith.constant 0 : index
    %c0_12 = arith.constant 0 : index
    %c1 = arith.constant 1 : index
    %c0_13 = arith.constant 0 : index
    %c0_14 = arith.constant 0 : index
    %c0_15 = arith.constant 0 : index
    %14 = vector.load %arg2[%c0_11, %c0_12, %c1, %c0_13, %c0_14, %c0_15] : memref<1x4x4x4x6x6xf32, #tpu.memory_space<vmem>>, vector<1x4x1x4x6x6xf32>
    %15 = vector.shape_cast %14 : vector<1x4x1x4x6x6xf32> to vector<4x4x6x6xf32>
    %16 = vector.extract_strided_slice %15 {offsets = [0, 0, 0, 0], sizes = [4, 3, 6, 6], strides = [1, 1, 1, 1]} : vector<4x4x6x6xf32> to vector<4x3x6x6xf32>
    %17 = vector.extract_strided_slice %15 {offsets = [0, 1, 0, 0], sizes = [4, 3, 6, 6], strides = [1, 1, 1, 1]} : vector<4x4x6x6xf32> to vector<4x3x6x6xf32>
    %18 = arith.maximumf %16, %17 : vector<4x3x6x6xf32>
    %19 = vector.extract_strided_slice %18 {offsets = [0, 0, 0, 0], sizes = [4, 3, 3, 6], strides = [1, 1, 1, 1]} : vector<4x3x6x6xf32> to vector<4x3x3x6xf32>
    %20 = vector.extract_strided_slice %18 {offsets = [0, 0, 1, 0], sizes = [4, 3, 3, 6], strides = [1, 1, 1, 1]} : vector<4x3x6x6xf32> to vector<4x3x3x6xf32>
    %21 = arith.maximumf %19, %20 : vector<4x3x3x6xf32>
    %22 = vector.extract_strided_slice %21 {offsets = [0, 0, 0, 0], sizes = [4, 3, 3, 3], strides = [1, 1, 1, 1]} : vector<4x3x3x6xf32> to vector<4x3x3x3xf32>
    %23 = vector.extract_strided_slice %21 {offsets = [0, 0, 0, 1], sizes = [4, 3, 3, 3], strides = [1, 1, 1, 1]} : vector<4x3x3x6xf32> to vector<4x3x3x3xf32>
    %24 = arith.maximumf %22, %23 : vector<4x3x3x3xf32>
    %c0_16 = arith.constant 0 : index
    %c0_17 = arith.constant 0 : index
    %c1_18 = arith.constant 1 : index
    %c0_19 = arith.constant 0 : index
    %c0_20 = arith.constant 0 : index
    %c0_21 = arith.constant 0 : index
    %25 = vector.load %arg3[%c0_16, %c0_17, %c1_18, %c0_19, %c0_20, %c0_21] : memref<1x4x3x3x3x3xf32, #tpu.memory_space<vmem>>, vector<1x4x1x3x3x3xf32>
    %26 = vector.shape_cast %25 : vector<1x4x1x3x3x3xf32> to vector<4x3x3x3xf32>
    %27 = vector.shape_cast %24 : vector<4x3x3x3xf32> to vector<1x4x1x3x3x3xf32>
    tpu.vector_store %arg3[%c0_16, %c0_17, %c1_18, %c0_19, %c0_20, %c0_21], %27 {strides = array<i32>} : memref<1x4x3x3x3x3xf32, #tpu.memory_space<vmem>>, vector<1x4x1x3x3x3xf32>,
    %c0_22 = arith.constant 0 : index
    %c0_23 = arith.constant 0 : index
    %c0_24 = arith.constant 0 : index
    %c0_25 = arith.constant 0 : index
    %c0_26 = arith.constant 0 : index
    %c0_27 = arith.constant 0 : index
    %28 = vector.load %arg3[%c0_22, %c0_23, %c0_24, %c0_25, %c0_26, %c0_27] : memref<1x4x3x3x3x3xf32, #tpu.memory_space<vmem>>, vector<1x4x1x3x3x3xf32>
    %29 = vector.shape_cast %28 : vector<1x4x1x3x3x3xf32> to vector<4x3x3x3xf32>
    %30 = arith.maximumf %29, %24 : vector<4x3x3x3xf32>
    %c0_28 = arith.constant 0 : index
    %c0_29 = arith.constant 0 : index
    %c0_30 = arith.constant 0 : index
    %c0_31 = arith.constant 0 : index
    %c0_32 = arith.constant 0 : index
    %c0_33 = arith.constant 0 : index
    %31 = vector.load %arg3[%c0_28, %c0_29, %c0_30, %c0_31, %c0_32, %c0_33] : memref<1x4x3x3x3x3xf32, #tpu.memory_space<vmem>>, vector<1x4x1x3x3x3xf32>
    %32 = vector.shape_cast %31 : vector<1x4x1x3x3x3xf32> to vector<4x3x3x3xf32>
    %33 = vector.shape_cast %30 : vector<4x3x3x3xf32> to vector<1x4x1x3x3x3xf32>
    tpu.vector_store %arg3[%c0_28, %c0_29, %c0_30, %c0_31, %c0_32, %c0_33], %33 {strides = array<i32>} : memref<1x4x3x3x3x3xf32, #tpu.memory_space<vmem>>, vector<1x4x1x3x3x3xf32>,
    %c0_34 = arith.constant 0 : index
    %c0_35 = arith.constant 0 : index
    %c2 = arith.constant 2 : index
    %c0_36 = arith.constant 0 : index
    %c0_37 = arith.constant 0 : index
    %c0_38 = arith.constant 0 : index
    %34 = vector.load %arg2[%c0_34, %c0_35, %c2, %c0_36, %c0_37, %c0_38] : memref<1x4x4x4x6x6xf32, #tpu.memory_space<vmem>>, vector<1x4x1x4x6x6xf32>
    %35 = vector.shape_cast %34 : vector<1x4x1x4x6x6xf32> to vector<4x4x6x6xf32>
    %36 = vector.extract_strided_slice %35 {offsets = [0, 0, 0, 0], sizes = [4, 3, 6, 6], strides = [1, 1, 1, 1]} : vector<4x4x6x6xf32> to vector<4x3x6x6xf32>
    %37 = vector.extract_strided_slice %35 {offsets = [0, 1, 0, 0], sizes = [4, 3, 6, 6], strides = [1, 1, 1, 1]} : vector<4x4x6x6xf32> to vector<4x3x6x6xf32>
    %38 = arith.maximumf %36, %37 : vector<4x3x6x6xf32>
    %39 = vector.extract_strided_slice %38 {offsets = [0, 0, 0, 0], sizes = [4, 3, 3, 6], strides = [1, 1, 1, 1]} : vector<4x3x6x6xf32> to vector<4x3x3x6xf32>
    %40 = vector.extract_strided_slice %38 {offsets = [0, 0, 1, 0], sizes = [4, 3, 3, 6], strides = [1, 1, 1, 1]} : vector<4x3x6x6xf32> to vector<4x3x3x6xf32>
    %41 = arith.maximumf %39, %40 : vector<4x3x3x6xf32>
    %42 = vector.extract_strided_slice %41 {offsets = [0, 0, 0, 0], sizes = [4, 3, 3, 3], strides = [1, 1, 1, 1]} : vector<4x3x3x6xf32> to vector<4x3x3x3xf32>
    %43 = vector.extract_strided_slice %41 {offsets = [0, 0, 0, 1], sizes = [4, 3, 3, 3], strides = [1, 1, 1, 1]} : vector<4x3x3x6xf32> to vector<4x3x3x3xf32>
    %44 = arith.maximumf %42, %43 : vector<4x3x3x3xf32>
    %c0_39 = arith.constant 0 : index
    %c0_40 = arith.constant 0 : index
    %c2_41 = arith.constant 2 : index
    %c0_42 = arith.constant 0 : index
    %c0_43 = arith.constant 0 : index
    %c0_44 = arith.constant 0 : index
    %45 = vector.load %arg3[%c0_39, %c0_40, %c2_41, %c0_42, %c0_43, %c0_44] : memref<1x4x3x3x3x3xf32, #tpu.memory_space<vmem>>, vector<1x4x1x3x3x3xf32>
    %46 = vector.shape_cast %45 : vector<1x4x1x3x3x3xf32> to vector<4x3x3x3xf32>
    %47 = vector.shape_cast %44 : vector<4x3x3x3xf32> to vector<1x4x1x3x3x3xf32>
    tpu.vector_store %arg3[%c0_39, %c0_40, %c2_41, %c0_42, %c0_43, %c0_44], %47 {strides = array<i32>} : memref<1x4x3x3x3x3xf32, #tpu.memory_space<vmem>>, vector<1x4x1x3x3x3xf32>,
    %c0_45 = arith.constant 0 : index
    %c0_46 = arith.constant 0 : index
    %c1_47 = arith.constant 1 : index
    %c0_48 = arith.constant 0 : index
    %c0_49 = arith.constant 0 : index
    %c0_50 = arith.constant 0 : index
    %48 = vector.load %arg3[%c0_45, %c0_46, %c1_47, %c0_48, %c0_49, %c0_50] : memref<1x4x3x3x3x3xf32, #tpu.memory_space<vmem>>, vector<1x4x1x3x3x3xf32>
    %49 = vector.shape_cast %48 : vector<1x4x1x3x3x3xf32> to vector<4x3x3x3xf32>
    %50 = arith.maximumf %49, %44 : vector<4x3x3x3xf32>
    %c0_51 = arith.constant 0 : index
    %c0_52 = arith.constant 0 : index
    %c1_53 = arith.constant 1 : index
    %c0_54 = arith.constant 0 : index
    %c0_55 = arith.constant 0 : index
    %c0_56 = arith.constant 0 : index
    %51 = vector.load %arg3[%c0_51, %c0_52, %c1_53, %c0_54, %c0_55, %c0_56] : memref<1x4x3x3x3x3xf32, #tpu.memory_space<vmem>>, vector<1x4x1x3x3x3xf32>
    %52 = vector.shape_cast %51 : vector<1x4x1x3x3x3xf32> to vector<4x3x3x3xf32>
    %53 = vector.shape_cast %50 : vector<4x3x3x3xf32> to vector<1x4x1x3x3x3xf32>
    tpu.vector_store %arg3[%c0_51, %c0_52, %c1_53, %c0_54, %c0_55, %c0_56], %53 {strides = array<i32>} : memref<1x4x3x3x3x3xf32, #tpu.memory_space<vmem>>, vector<1x4x1x3x3x3xf32>,
    %c0_57 = arith.constant 0 : index
    %c0_58 = arith.constant 0 : index
    %c3 = arith.constant 3 : index
    %c0_59 = arith.constant 0 : index
    %c0_60 = arith.constant 0 : index
    %c0_61 = arith.constant 0 : index
    %54 = vector.load %arg2[%c0_57, %c0_58, %c3, %c0_59, %c0_60, %c0_61] : memref<1x4x4x4x6x6xf32, #tpu.memory_space<vmem>>, vector<1x4x1x4x6x6xf32>
    %55 = vector.shape_cast %54 : vector<1x4x1x4x6x6xf32> to vector<4x4x6x6xf32>
    %56 = vector.extract_strided_slice %55 {offsets = [0, 0, 0, 0], sizes = [4, 3, 6, 6], strides = [1, 1, 1, 1]} : vector<4x4x6x6xf32> to vector<4x3x6x6xf32>
    %57 = vector.extract_strided_slice %55 {offsets = [0, 1, 0, 0], sizes = [4, 3, 6, 6], strides = [1, 1, 1, 1]} : vector<4x4x6x6xf32> to vector<4x3x6x6xf32>
    %58 = arith.maximumf %56, %57 : vector<4x3x6x6xf32>
    %59 = vector.extract_strided_slice %58 {offsets = [0, 0, 0, 0], sizes = [4, 3, 3, 6], strides = [1, 1, 1, 1]} : vector<4x3x6x6xf32> to vector<4x3x3x6xf32>
    %60 = vector.extract_strided_slice %58 {offsets = [0, 0, 1, 0], sizes = [4, 3, 3, 6], strides = [1, 1, 1, 1]} : vector<4x3x6x6xf32> to vector<4x3x3x6xf32>
    %61 = arith.maximumf %59, %60 : vector<4x3x3x6xf32>
    %62 = vector.extract_strided_slice %61 {offsets = [0, 0, 0, 0], sizes = [4, 3, 3, 3], strides = [1, 1, 1, 1]} : vector<4x3x3x6xf32> to vector<4x3x3x3xf32>
    %63 = vector.extract_strided_slice %61 {offsets = [0, 0, 0, 1], sizes = [4, 3, 3, 3], strides = [1, 1, 1, 1]} : vector<4x3x3x6xf32> to vector<4x3x3x3xf32>
    %64 = arith.maximumf %62, %63 : vector<4x3x3x3xf32>
    %c0_62 = arith.constant 0 : index
    %c0_63 = arith.constant 0 : index
    %c2_64 = arith.constant 2 : index
    %c0_65 = arith.constant 0 : index
    %c0_66 = arith.constant 0 : index
    %c0_67 = arith.constant 0 : index
    %65 = vector.load %arg3[%c0_62, %c0_63, %c2_64, %c0_65, %c0_66, %c0_67] : memref<1x4x3x3x3x3xf32, #tpu.memory_space<vmem>>, vector<1x4x1x3x3x3xf32>
    %66 = vector.shape_cast %65 : vector<1x4x1x3x3x3xf32> to vector<4x3x3x3xf32>
    %67 = arith.maximumf %66, %64 : vector<4x3x3x3xf32>
    %c0_68 = arith.constant 0 : index
    %c0_69 = arith.constant 0 : index
    %c2_70 = arith.constant 2 : index
    %c0_71 = arith.constant 0 : index
    %c0_72 = arith.constant 0 : index
    %c0_73 = arith.constant 0 : index
    %68 = vector.load %arg3[%c0_68, %c0_69, %c2_70, %c0_71, %c0_72, %c0_73] : memref<1x4x3x3x3x3xf32, #tpu.memory_space<vmem>>, vector<1x4x1x3x3x3xf32>
    %69 = vector.shape_cast %68 : vector<1x4x1x3x3x3xf32> to vector<4x3x3x3xf32>
    %70 = vector.shape_cast %67 : vector<4x3x3x3xf32> to vector<1x4x1x3x3x3xf32>
    tpu.vector_store %arg3[%c0_68, %c0_69, %c2_70, %c0_71, %c0_72, %c0_73], %70 {strides = array<i32>} : memref<1x4x3x3x3x3xf32, #tpu.memory_space<vmem>>, vector<1x4x1x3x3x3xf32>,
    return
  }
  func.func @transform_0(%arg0: i32, %arg1: i32) -> (i32, i32, i32, i32, i32, i32) {
    %c0_i32 = arith.constant 0 : i32
    %c0_i32_0 = arith.constant 0 : i32
    %c0_i32_1 = arith.constant 0 : i32
    %c0_i32_2 = arith.constant 0 : i32
    %c0_i32_3 = arith.constant 0 : i32
    return %arg0, %arg1, %c0_i32, %c0_i32_0, %c0_i32_1, %c0_i32_2 : i32, i32, i32, i32, i32, i32
  }
  func.func @transform_1(%arg0: i32, %arg1: i32) -> (i32, i32, i32, i32, i32, i32) {
    %c0_i32 = arith.constant 0 : i32
    %c0_i32_0 = arith.constant 0 : i32
    %c0_i32_1 = arith.constant 0 : i32
    %c0_i32_2 = arith.constant 0 : i32
    %c0_i32_3 = arith.constant 0 : i32
    return %arg0, %arg1, %c0_i32, %c0_i32_0, %c0_i32_1, %c0_i32_2 : i32, i32, i32, i32, i32, i32
  }
}

</mosaic_0001>

<bundles_post_ra>
// kernel: tpu_custom_call.1
= control target key start
LH: loop header
LB: loop body
LE: loop exit
PB: predicated region body
PF: predicated region fallthrough
CT: control target
= control target key end

     0   :  { %s1450_s6 = smov 0   ;;  %s1452_s7 = smov 0   ;;  %s2136_s0 = inlined_call_operand.vmem [shape: f32[2,4,6,6,6,6], index: 0, kind: input, shape index: {}]   ;;  %s2137_s1 = inlined_call_operand.vmem [shape: f32[2,4,3,3,3,3], index: 1, kind: output, shape index: {}]  }
   0x1   :  { %s1454_s8 = smov 0   ;;  %s1456_s9 = smov 0  }
   0x2   :  { %s1458_s10 = smov 0  }
   0x3 LB: > { %s23_s11 = sadd.s32 1, %s1433_s9  ;;  %p39_p1 = scmp.ne.s32.totalorder %s1425_s7, %s1421_s6  ;;  %s1437_s10 = sphi %s1458_s10, %s11_s10   ;;  %s1433_s9 = sphi %s1456_s9, %s2141_s9   ;;  %s1429_s8 = sphi %s1454_s8, %s2140_s8   ;;  %s1425_s7 = sphi %s1452_s7, %s2139_s7   ;;  %s1421_s6 = sphi %s1450_s6, %s2138_s6  }
   0x4   : > { %p25_p0 = scmp.ge.s32.totalorder %s23_s11, 2  ;;  %p40_p2 = scmp.eq.s32.totalorder %s1437_s10, 0 }
   0x5   : > { %s32_s13 = sadd.s32 1, %s1425_s7  ;;  %p1228_p5 = scmp.ge.s32.totalorder %s1437_s10, 2 }
   0x6   : > { %s2143_s11 = smov (%p25_p0, %s23_s11), 0  ;;  %p41_p3 = por %p40_p2, %p39_p1 }
   0x7   : > { %s27_s12 = ssub.s32 %s1433_s9, %s2143_s11  ;;  %93 = sbr.rel (%p1228_p5) target bundleno = 51 (0x33), region = 16 }
   0x8   : > { %p30_p4 = scmp.eq.s32.totalorder %s27_s12, 0 }
   0xa   : > { %s1485_s14 = scalar_select %p30_p4, %s1425_s7, %s32_s13  }
   0xe   : > { %96 = sbr.rel (!%p41_p3) target bundleno = 51 (0x33), region = 20  ;;  %s98_s15 = sand.u32 (%p41_p3), 1, %s1425_s7  }
   0xf   : > { %s1356_s16 = smul.u32 (%p41_p3), 1152, %s1433_s9  ;;  %s1229_s17 = sshll.u32 (%p41_p3), %s98_s15, 9 }
  0x10   : > { %s1498_s21 = scalar_lea.vmem (%p41_p3), [#allocation2], %s1229_s17 }
  0x11   : > { %s1493_s20 = scalar_lea.vmem (%p41_p3), %s2136_s0, %s1356_s16 }
  0x12   : > { %v260_v0 = vld [vmem:[%s1493_s20] sm:$0xff] (%p41_p3)  ;;  %v262_v1 = vld [vmem:[%s1493_s20 + $0x8] sm:$0xff] (%p41_p3)  ;;  %v264_v2 = vld [vmem:[%s1493_s20 + $0x10] sm:$0xff] (%p41_p3) }
  0x13   : > { %261 = vst [vmem:[%s1498_s21] sm:$0xff] (%p41_p3), %v260_v0  ;;  %263 = vst [vmem:[%s1498_s21 + $0x8] sm:$0xff] (%p41_p3), %v262_v1  ;;  %v266_v3 = vld [vmem:[%s1493_s20 + $0x18] sm:$0xff] (%p41_p3)  ;;  %v268_v4 = vld [vmem:[%s1493_s20 + $0x30] sm:$0xff] (%p41_p3) }
  0x14   : > { %265 = vst [vmem:[%s1498_s21 + $0x10] sm:$0xff] (%p41_p3), %v264_v2  ;;  %v270_v5 = vld [vmem:[%s1493_s20 + $0x38] sm:$0xff] (%p41_p3)  ;;  %267 = vst [vmem:[%s1498_s21 + $0x18] sm:$0xff] (%p41_p3), %v266_v3  ;;  %v272_v6 = vld [vmem:[%s1493_s20 + $0x40] sm:$0xff] (%p41_p3) }
  0x15   : > { %269 = vst [vmem:[%s1498_s21 + $0x20] sm:$0xff] %v268_v4  ;;  %271 = vst [vmem:[%s1498_s21 + $0x28] sm:$0xff] %v270_v5  ;;  %v274_v7 = vld [vmem:[%s1493_s20 + $0x48] sm:$0xff]  ;;  %v276_v8 = vld [vmem:[%s1493_s20 + $0x60] sm:$0xff] }
  0x16   : > { %273 = vst [vmem:[%s1498_s21 + $0x30] sm:$0xff] %v272_v6  ;;  %275 = vst [vmem:[%s1498_s21 + $0x38] sm:$0xff] %v274_v7  ;;  %v278_v9 = vld [vmem:[%s1493_s20 + $0x68] sm:$0xff]  ;;  %v280_v10 = vld [vmem:[%s1493_s20 + $0x70] sm:$0xff] }
  0x17   : > { %277 = vst [vmem:[%s1498_s21 + $0x40] sm:$0xff] %v276_v8  ;;  %v282_v11 = vld [vmem:[%s1493_s20 + $0x78] sm:$0xff]  ;;  %279 = vst [vmem:[%s1498_s21 + $0x48] sm:$0xff] %v278_v9  ;;  %v284_v12 = vld [vmem:[%s1493_s20 + $0x90] sm:$0xff] }
  0x18   : > { %281 = vst [vmem:[%s1498_s21 + $0x50] sm:$0xff] %v280_v10  ;;  %283 = vst [vmem:[%s1498_s21 + $0x58] sm:$0xff] %v282_v11  ;;  %v286_v13 = vld [vmem:[%s1493_s20 + $0x98] sm:$0xff]  ;;  %v288_v14 = vld [vmem:[%s1493_s20 + $0xa0] sm:$0xff] }
  0x19   : > { %285 = vst [vmem:[%s1498_s21 + $0x60] sm:$0xff] %v284_v12  ;;  %287 = vst [vmem:[%s1498_s21 + $0x68] sm:$0xff] %v286_v13  ;;  %v290_v15 = vld [vmem:[%s1493_s20 + $0xa8] sm:$0xff]  ;;  %v292_v16 = vld [vmem:[%s1493_s20 + $0x120] sm:$0xff] }
  0x1a   : > { %289 = vst [vmem:[%s1498_s21 + $0x70] sm:$0xff] %v288_v14  ;;  %v294_v17 = vld [vmem:[%s1493_s20 + $0x128] sm:$0xff]  ;;  %291 = vst [vmem:[%s1498_s21 + $0x78] sm:$0xff] %v290_v15  ;;  %v296_v18 = vld [vmem:[%s1493_s20 + $0x130] sm:$0xff] }
  0x1b   : > { %293 = vst [vmem:[%s1498_s21 + $0x80] sm:$0xff] %v292_v16  ;;  %295 = vst [vmem:[%s1498_s21 + $0x88] sm:$0xff] %v294_v17  ;;  %v298_v19 = vld [vmem:[%s1493_s20 + $0x138] sm:$0xff]  ;;  %v300_v20 = vld [vmem:[%s1493_s20 + $0x150] sm:$0xff] }
  0x1c   : > { %297 = vst [vmem:[%s1498_s21 + $0x90] sm:$0xff] %v296_v18  ;;  %299 = vst [vmem:[%s1498_s21 + $0x98] sm:$0xff] %v298_v19  ;;  %v302_v21 = vld [vmem:[%s1493_s20 + $0x158] sm:$0xff]  ;;  %v304_v22 = vld [vmem:[%s1493_s20 + $0x160] sm:$0xff] }
  0x1d   : > { %301 = vst [vmem:[%s1498_s21 + $0xa0] sm:$0xff] %v300_v20  ;;  %v306_v23 = vld [vmem:[%s1493_s20 + $0x168] sm:$0xff]  ;;  %303 = vst [vmem:[%s1498_s21 + $0xa8] sm:$0xff] %v302_v21  ;;  %v308_v24 = vld [vmem:[%s1493_s20 + $0x180] sm:$0xff] }
  0x1e   : > { %305 = vst [vmem:[%s1498_s21 + $0xb0] sm:$0xff] %v304_v22  ;;  %307 = vst [vmem:[%s1498_s21 + $0xb8] sm:$0xff] %v306_v23  ;;  %v310_v25 = vld [vmem:[%s1493_s20 + $0x188] sm:$0xff]  ;;  %v312_v26 = vld [vmem:[%s1493_s20 + $0x190] sm:$0xff] }
  0x1f   : > { %309 = vst [vmem:[%s1498_s21 + $0xc0] sm:$0xff] %v308_v24  ;;  %311 = vst [vmem:[%s1498_s21 + $0xc8] sm:$0xff] %v310_v25  ;;  %v314_v27 = vld [vmem:[%s1493_s20 + $0x198] sm:$0xff]  ;;  %v316_v28 = vld [vmem:[%s1493_s20 + $0x1b0] sm:$0xff] }
  0x20   : > { %313 = vst [vmem:[%s1498_s21 + $0xd0] sm:$0xff] %v312_v26  ;;  %v318_v29 = vld [vmem:[%s1493_s20 + $0x1b8] sm:$0xff]  ;;  %315 = vst [vmem:[%s1498_s21 + $0xd8] sm:$0xff] %v314_v27  ;;  %v320_v30 = vld [vmem:[%s1493_s20 + $0x1c0] sm:$0xff] }
  0x21   : > { %317 = vst [vmem:[%s1498_s21 + $0xe0] sm:$0xff] %v316_v28  ;;  %319 = vst [vmem:[%s1498_s21 + $0xe8] sm:$0xff] %v318_v29  ;;  %v322_v31 = vld [vmem:[%s1493_s20 + $0x1c8] sm:$0xff]  ;;  %v324_v32 = vld [vmem:[%s1493_s20 + $0x240] sm:$0xff] }
  0x22   : > { %321 = vst [vmem:[%s1498_s21 + $0xf0] sm:$0xff] %v320_v30  ;;  %323 = vst [vmem:[%s1498_s21 + $0xf8] sm:$0xff] %v322_v31  ;;  %v326_v33 = vld [vmem:[%s1493_s20 + $0x248] sm:$0xff]  ;;  %v328_v34 = vld [vmem:[%s1493_s20 + $0x250] sm:$0xff] }
  0x23   : > { %325 = vst [vmem:[%s1498_s21 + $0x100] sm:$0xff] %v324_v32  ;;  %v330_v35 = vld [vmem:[%s1493_s20 + $0x258] sm:$0xff]  ;;  %327 = vst [vmem:[%s1498_s21 + $0x108] sm:$0xff] %v326_v33  ;;  %v332_v36 = vld [vmem:[%s1493_s20 + $0x270] sm:$0xff] }
  0x24   : > { %329 = vst [vmem:[%s1498_s21 + $0x110] sm:$0xff] %v328_v34  ;;  %331 = vst [vmem:[%s1498_s21 + $0x118] sm:$0xff] %v330_v35  ;;  %v334_v37 = vld [vmem:[%s1493_s20 + $0x278] sm:$0xff]  ;;  %v336_v38 = vld [vmem:[%s1493_s20 + $0x280] sm:$0xff] }
  0x25   : > { %333 = vst [vmem:[%s1498_s21 + $0x120] sm:$0xff] %v332_v36  ;;  %335 = vst [vmem:[%s1498_s21 + $0x128] sm:$0xff] %v334_v37  ;;  %v338_v39 = vld [vmem:[%s1493_s20 + $0x288] sm:$0xff]  ;;  %v340_v40 = vld [vmem:[%s1493_s20 + $0x2a0] sm:$0xff] }
  0x26   : > { %337 = vst [vmem:[%s1498_s21 + $0x130] sm:$0xff] %v336_v38  ;;  %v342_v41 = vld [vmem:[%s1493_s20 + $0x2a8] sm:$0xff]  ;;  %339 = vst [vmem:[%s1498_s21 + $0x138] sm:$0xff] %v338_v39  ;;  %v344_v42 = vld [vmem:[%s1493_s20 + $0x2b0] sm:$0xff] }
  0x27   : > { %341 = vst [vmem:[%s1498_s21 + $0x140] sm:$0xff] %v340_v40  ;;  %343 = vst [vmem:[%s1498_s21 + $0x148] sm:$0xff] %v342_v41  ;;  %v346_v43 = vld [vmem:[%s1493_s20 + $0x2b8] sm:$0xff]  ;;  %v348_v44 = vld [vmem:[%s1493_s20 + $0x2d0] sm:$0xff] }
  0x28   : > { %345 = vst [vmem:[%s1498_s21 + $0x150] sm:$0xff] %v344_v42  ;;  %347 = vst [vmem:[%s1498_s21 + $0x158] sm:$0xff] %v346_v43  ;;  %v350_v45 = vld [vmem:[%s1493_s20 + $0x2d8] sm:$0xff]  ;;  %v352_v46 = vld [vmem:[%s1493_s20 + $0x2e0] sm:$0xff] }
  0x29   : > { %349 = vst [vmem:[%s1498_s21 + $0x160] sm:$0xff] %v348_v44  ;;  %v354_v47 = vld [vmem:[%s1493_s20 + $0x2e8] sm:$0xff]  ;;  %351 = vst [vmem:[%s1498_s21 + $0x168] sm:$0xff] %v350_v45  ;;  %v356_v48 = vld [vmem:[%s1493_s20 + $0x360] sm:$0xff] }
  0x2a   : > { %353 = vst [vmem:[%s1498_s21 + $0x170] sm:$0xff] %v352_v46  ;;  %355 = vst [vmem:[%s1498_s21 + $0x178] sm:$0xff] %v354_v47  ;;  %v358_v49 = vld [vmem:[%s1493_s20 + $0x368] sm:$0xff]  ;;  %v360_v50 = vld [vmem:[%s1493_s20 + $0x370] sm:$0xff] }
  0x2b   : > { %357 = vst [vmem:[%s1498_s21 + $0x180] sm:$0xff] %v356_v48  ;;  %359 = vst [vmem:[%s1498_s21 + $0x188] sm:$0xff] %v358_v49  ;;  %v362_v51 = vld [vmem:[%s1493_s20 + $0x378] sm:$0xff]  ;;  %v364_v52 = vld [vmem:[%s1493_s20 + $0x390] sm:$0xff] }
  0x2c   : > { %361 = vst [vmem:[%s1498_s21 + $0x190] sm:$0xff] %v360_v50  ;;  %v366_v53 = vld [vmem:[%s1493_s20 + $0x398] sm:$0xff]  ;;  %363 = vst [vmem:[%s1498_s21 + $0x198] sm:$0xff] %v362_v51  ;;  %v368_v54 = vld [vmem:[%s1493_s20 + $0x3a0] sm:$0xff] }
  0x2d   : > { %365 = vst [vmem:[%s1498_s21 + $0x1a0] sm:$0xff] %v364_v52  ;;  %367 = vst [vmem:[%s1498_s21 + $0x1a8] sm:$0xff] %v366_v53  ;;  %v370_v55 = vld [vmem:[%s1493_s20 + $0x3a8] sm:$0xff]  ;;  %v372_v56 = vld [vmem:[%s1493_s20 + $0x3c0] sm:$0xff] }
  0x2e   : > { %369 = vst [vmem:[%s1498_s21 + $0x1b0] sm:$0xff] %v368_v54  ;;  %371 = vst [vmem:[%s1498_s21 + $0x1b8] sm:$0xff] %v370_v55  ;;  %v374_v57 = vld [vmem:[%s1493_s20 + $0x3c8] sm:$0xff]  ;;  %v376_v58 = vld [vmem:[%s1493_s20 + $0x3d0] sm:$0xff] }
  0x2f   : > { %373 = vst [vmem:[%s1498_s21 + $0x1c0] sm:$0xff] %v372_v56  ;;  %v378_v59 = vld [vmem:[%s1493_s20 + $0x3d8] sm:$0xff]  ;;  %375 = vst [vmem:[%s1498_s21 + $0x1c8] sm:$0xff] %v374_v57  ;;  %v380_v60 = vld [vmem:[%s1493_s20 + $0x3f0] sm:$0xff] }
  0x30   : > { %377 = vst [vmem:[%s1498_s21 + $0x1d0] sm:$0xff] %v376_v58  ;;  %379 = vst [vmem:[%s1498_s21 + $0x1d8] sm:$0xff] %v378_v59  ;;  %v382_v61 = vld [vmem:[%s1493_s20 + $0x3f8] sm:$0xff]  ;;  %v384_v62 = vld [vmem:[%s1493_s20 + $0x400] sm:$0xff] }
  0x31   : > { %381 = vst [vmem:[%s1498_s21 + $0x1e0] sm:$0xff] %v380_v60  ;;  %383 = vst [vmem:[%s1498_s21 + $0x1e8] sm:$0xff] %v382_v61  ;;  %v386_v63 = vld [vmem:[%s1493_s20 + $0x408] sm:$0xff] }
  0x32   : > { %385 = vst [vmem:[%s1498_s21 + $0x1f0] sm:$0xff] %v384_v62  ;;  %387 = vst [vmem:[%s1498_s21 + $0x1f8] sm:$0xff] %v386_v63 }
  0x33 PF: > { %p1231_p6 = scmp.ge.s32.totalorder %s1437_s10, 1  ;;  %p392_p7 = scmp.lt.s32.totalorder %s1437_s10, 3 }
  0x35   : > { %p393_p8 = pnand %p1231_p6, %p392_p7 }
  0x36   : > { %s399_s22 = sand.u32 (!%p393_p8), 1, %s1421_s6   ;;  %s1439_s25 = smov (!%p393_p8), 127   ;;  %vm571_vm0 = vcmask (!%p393_p8), 18432  }
  0x37   : > { %396 = sbr.rel (%p393_p8) target bundleno = 277 (0x115), region = 58  ;;  %s1232_s23 = sshll.u32 (!%p393_p8), %s399_s22, 9 }
  0x38   : > { %s1628_s24 = scalar_lea.vmem (!%p393_p8), [#allocation2], %s1232_s23  ;;  %p425_p9 = scmp.lt.s32.totalorder (!%p393_p8), %s1429_s8, 1 }
  0x39   : > { %v437_v0 = vld [vmem:[%s1628_s24 + $0x10] sm:$0x3f] (!%p393_p8)  ;;  %v438_v1 = vld [vmem:[%s1628_s24 + $0x18] sm:$0x3f] (!%p393_p8)  ;;  %v435_v2 = vld [vmem:[%s1628_s24] sm:$0x3f] (!%p393_p8) }
  0x3a   : > { %v453_v3 = vmax.f32 (!%p393_p8), %v437_v0, %v438_v1  ;;  %v436_v4 = vld [vmem:[%s1628_s24 + $0x8] sm:$0x3f] (!%p393_p8)  ;;  %v439_v5 = vld [vmem:[%s1628_s24 + $0x80] sm:$0x3f] (!%p393_p8)  ;;  %v441_v10 = vld [vmem:[%s1628_s24 + $0x90] sm:$0x3f] (!%p393_p8) }
  0x3b   : > { %v440_v6 = vld [vmem:[%s1628_s24 + $0x88] sm:$0x3f] (!%p393_p8)  ;;  %v451_v7 = vmax.f32 (!%p393_p8), %v435_v2, %v436_v4  ;;  %v452_v8 = vmax.f32 (!%p393_p8), %v436_v4, %v437_v0  ;;  %v442_v11 = vld [vmem:[%s1628_s24 + $0x98] sm:$0x3f] (!%p393_p8)  ;;  %v445_v19 = vld [vmem:[%s1628_s24 + $0x110] sm:$0x3f] (!%p393_p8) }
  0x3c   : > { %v454_v9 = vmax.f32 (!%p393_p8), %v439_v5, %v440_v6  ;;  %v477_v12 = vrot.slane (!%p393_p8), %v453_v3, 1  ;;  %v456_v13 = vmax.f32 (!%p393_p8), %v441_v10, %v442_v11  ;;  %v444_v14 = vld [vmem:[%s1628_s24 + $0x108] sm:$0x3f] (!%p393_p8)  ;;  %v455_v18 = vmax.f32 (!%p393_p8), %v440_v6, %v441_v10  ;;  %v443_v21 = vld [vmem:[%s1628_s24 + $0x100] sm:$0x3f] (!%p393_p8) }
  0x3d   : > { %v475_v15 = vrot.slane (!%p393_p8), %v451_v7, 1  ;;  %v476_v17 = vrot.slane (!%p393_p8), %v452_v8, 1  ;;  %v458_v25 = vmax.f32 (!%p393_p8), %v444_v14, %v445_v19  ;;  %v457_v28 = vmax.f32 (!%p393_p8), %v443_v21, %v444_v14  ;;  %v447_v29 = vld [vmem:[%s1628_s24 + $0x180] sm:$0x3f] (!%p393_p8)  ;;  %v448_v30 = vld [vmem:[%s1628_s24 + $0x188] sm:$0x3f] (!%p393_p8) }
  0x3e   : > { %v478_v16 = vrot.slane %v454_v9, 1  ;;  %v1640_v20 = vmax.f32 %v453_v3, %v477_v12  ;;  %v480_v24 = vrot.slane %v456_v13, 1  ;;  %v479_v27 = vrot.slane %v455_v18, 1  ;;  %v446_v31 = vld [vmem:[%s1628_s24 + $0x118] sm:$0x3f]  ;;  %s2145_s8 = smov (!%p425_p9, %s1429_s8), 1 }
  0x3f   : > { %v1643_v22 = vmax.f32 %v451_v7, %v475_v15  ;;  %v1651_v26 = vmax.f32 %v452_v8, %v476_v17  ;;  %v482_v33 = vrot.slane %v458_v25, 1  ;;  %v460_v34 = vmax.f32 %v447_v29, %v448_v30  ;;  %v449_v38 = vld [vmem:[%s1628_s24 + $0x190] sm:$0x3f]  ;;  %v450_v39 = vld [vmem:[%s1628_s24 + $0x198] sm:$0x3f]  ;;  %s1357_s26 = smul.u32 144, %s2145_s8 }
  0x40   : > { %527 = vrot.lane.b32.xlu1 %v1640_v20, %s1439_s25  ;;  %v1647_v23 = vmax.f32 %v454_v9, %v478_v16  ;;  %v1658_v32 = vmax.f32 %v456_v13, %v480_v24  ;;  %v1662_v35 = vmax.f32 %v455_v18, %v479_v27  ;;  %v481_v36 = vrot.slane %v457_v28, 1  ;;  %v1235_v46 = vld [vmem:[%s1628_s24 + $0x28] sm:$0x3f]  ;;  %v1236_v47 = vld [vmem:[%s1628_s24 + $0x30] sm:$0x3f] }
  0x41   : > { %523 = vrot.lane.b32.xlu0 %v1643_v22, %s1439_s25  ;;  %v459_v37 = vmax.f32 %v445_v19, %v446_v31  ;;  %v1668_v40 = vmax.f32 %v458_v25, %v482_v33  ;;  %v484_v41 = vrot.slane %v460_v34, 1  ;;  %v462_v42 = vmax.f32 %v449_v38, %v450_v39  ;;  %v1234_v48 = vld [vmem:[%s1628_s24 + $0x20] sm:$0x3f]  ;;  %v1239_v56 = vld [vmem:[%s1628_s24 + $0xa8] sm:$0x3f]  ;;  %s1891_s29 = scalar_lea.vmem %s2137_s1, %s1357_s26 }
  0x42   : > { %v1672_v43 = vmax.f32 %v457_v28, %v481_v36  ;;  %v461_v45 = vmax.f32 %v448_v30, %v449_v38  ;;  %v602_v51 = vmax.f32 %v1235_v46, %v1236_v47  ;;  %v601_v54 = vmax.f32 %v1234_v48, %v1235_v46  ;;  %v1238_v55 = vld [vmem:[%s1628_s24 + $0xa0] sm:$0x3f]  ;;  %v1237_v57 = vld [vmem:[%s1628_s24 + $0x38] sm:$0x3f]  ;;  %v1240_v0 = vld [vmem:[%s1628_s24 + $0xb0] sm:$0x3f] }
  0x43   : > { %v483_v44 = vrot.slane %v459_v37, 1  ;;  %v1679_v49 = vmax.f32 %v460_v34, %v484_v41  ;;  %v486_v50 = vrot.slane %v462_v42, 1  ;;  %v604_v60 = vmax.f32 %v1238_v55, %v1239_v56  ;;  %v1241_v1 = vld [vmem:[%s1628_s24 + $0xb8] sm:$0x3f]  ;;  %v1243_v8 = vld [vmem:[%s1628_s24 + $0x128] sm:$0x3f] }
  0x44   : > { %529 = vrot.lane.b32.xlu1 %v1647_v23, %s1439_s25  ;;  %v485_v53 = vrot.slane %v461_v45, 1  ;;  %v626_v59 = vrot.slane %v602_v51, 1  ;;  %v625_v62 = vrot.slane %v601_v54, 1  ;;  %v603_v63 = vmax.f32 %v1236_v47, %v1237_v57  ;;  %v1244_v9 = vld [vmem:[%s1628_s24 + $0x130] sm:$0x3f] }
  0x45   : > { %525 = vrot.lane.b32.xlu0 %v1651_v26, %s1439_s25  ;;  %v1683_v52 = vmax.f32 %v459_v37, %v483_v44  ;;  %v1690_v58 = vmax.f32 %v462_v42, %v486_v50  ;;  %v628_v3 = vrot.slane %v604_v60, 1  ;;  %v606_v4 = vmax.f32 %v1240_v0, %v1241_v1  ;;  %v1242_v10 = vld [vmem:[%s1628_s24 + $0x120] sm:$0x3f]  ;;  %v1247_v18 = vld [vmem:[%s1628_s24 + $0x1a8] sm:$0x3f] }
  0x46   : > { %v1694_v61 = vmax.f32 %v461_v45, %v485_v53  ;;  %v1700_v2 = vmax.f32 %v602_v51, %v626_v59  ;;  %v1704_v5 = vmax.f32 %v601_v54, %v625_v62  ;;  %v627_v6 = vrot.slane %v603_v63, 1  ;;  %v1246_v17 = vld [vmem:[%s1628_s24 + $0x1a0] sm:$0x3f]  ;;  %v1245_v19 = vld [vmem:[%s1628_s24 + $0x138] sm:$0x3f] }
  0x47   : > { %v605_v7 = vmax.f32 %v1239_v56, %v1240_v0  ;;  %v1711_v11 = vmax.f32 %v604_v60, %v628_v3  ;;  %v630_v12 = vrot.slane %v606_v4, 1  ;;  %v608_v13 = vmax.f32 %v1243_v8, %v1244_v9  ;;  %v1248_v30 = vld [vmem:[%s1628_s24 + $0x1b0] sm:$0x3f]  ;;  %v1249_v31 = vld [vmem:[%s1628_s24 + $0x1b8] sm:$0x3f] }
  0x48   : > { %533 = vrot.lane.b32.xlu1 %v1658_v32, %s1439_s25  ;;  %v1715_v14 = vmax.f32 %v603_v63, %v627_v6  ;;  %v607_v16 = vmax.f32 %v1242_v10, %v1243_v8  ;;  %v610_v25 = vmax.f32 %v1246_v17, %v1247_v18  ;;  %v609_v29 = vmax.f32 %v1244_v9, %v1245_v19  ;;  %v1263_v41 = vld [vmem:[%s1628_s24 + $0x48] sm:$0x3f]  ;;  %v1264_v42 = vld [vmem:[%s1628_s24 + $0x50] sm:$0x3f]  ;;  %v1262_v44 = vld [vmem:[%s1628_s24 + $0x40] sm:$0x3f] }
  0x49   : > { %531 = vrot.lane.b32.xlu0 %v1662_v35, %s1439_s25  ;;  %v629_v15 = vrot.slane %v605_v7, 1  ;;  %v1722_v21 = vmax.f32 %v606_v4, %v630_v12  ;;  %v632_v24 = vrot.slane %v608_v13, 1  ;;  %v612_v36 = vmax.f32 %v1248_v30, %v1249_v31  ;;  %v1266_v53 = vld [vmem:[%s1628_s24 + $0xc0] sm:$0x3f]  ;;  %v1267_v54 = vld [vmem:[%s1628_s24 + $0xc8] sm:$0x3f] }
  0x4a   : > { %v631_v28 = vrot.slane %v607_v16, 1  ;;  %v634_v34 = vrot.slane %v610_v25, 1  ;;  %v633_v38 = vrot.slane %v609_v29, 1  ;;  %v611_v39 = vmax.f32 %v1247_v18, %v1248_v30  ;;  %v1265_v55 = vld [vmem:[%s1628_s24 + $0x58] sm:$0x3f] }
  0x4b   : > { %v1726_v27 = vmax.f32 %v605_v7, %v629_v15  ;;  %v1732_v33 = vmax.f32 %v608_v13, %v632_v24  ;;  %v636_v46 = vrot.slane %v612_v36, 1  ;;  %v788_v47 = vmax.f32 %v1263_v41, %v1264_v42  ;;  %v1268_v0 = vld [vmem:[%s1628_s24 + $0xd0] sm:$0x3f]  ;;  %v1269_v1 = vld [vmem:[%s1628_s24 + $0xd8] sm:$0x3f] }
  0x4c   : > { %537 = vrot.lane.b32.xlu1 %v1668_v40, %s1439_s25  ;;  %v1736_v37 = vmax.f32 %v607_v16, %v631_v28  ;;  %v1743_v45 = vmax.f32 %v610_v25, %v634_v34  ;;  %v1747_v48 = vmax.f32 %v609_v29, %v633_v38  ;;  %v635_v50 = vrot.slane %v611_v39, 1  ;;  %v1271_v10 = vld [vmem:[%s1628_s24 + $0x148] sm:$0x3f]  ;;  %v1272_v12 = vld [vmem:[%s1628_s24 + $0x150] sm:$0x3f] }
  0x4d   : > { %535 = vrot.lane.b32.xlu0 %v1672_v43, %s1439_s25  ;;  %v787_v51 = vmax.f32 %v1262_v44, %v1263_v41  ;;  %v1754_v56 = vmax.f32 %v612_v36, %v636_v46  ;;  %v812_v57 = vrot.slane %v788_v47, 1  ;;  %v790_v59 = vmax.f32 %v1266_v53, %v1267_v54  ;;  %v1270_v13 = vld [vmem:[%s1628_s24 + $0x140] sm:$0x3f]  ;;  %v1275_v28 = vld [vmem:[%s1628_s24 + $0x1c8] sm:$0x3f] }
  0x4e   : > { %v1758_v60 = vmax.f32 %v611_v39, %v635_v50  ;;  %v789_v63 = vmax.f32 %v1264_v42, %v1265_v55  ;;  %v792_v6 = vmax.f32 %v1268_v0, %v1269_v1  ;;  %v791_v9 = vmax.f32 %v1267_v54, %v1268_v0  ;;  %v1274_v25 = vld [vmem:[%s1628_s24 + $0x1c0] sm:$0x3f]  ;;  %v1273_v29 = vld [vmem:[%s1628_s24 + $0x158] sm:$0x3f]  ;;  %v1276_v41 = vld [vmem:[%s1628_s24 + $0x1d0] sm:$0x3f] }
  0x4f   : > { %v811_v62 = vrot.slane %v787_v51, 1  ;;  %v1764_v3 = vmax.f32 %v788_v47, %v812_v57  ;;  %v814_v4 = vrot.slane %v790_v59, 1  ;;  %v794_v17 = vmax.f32 %v1271_v10, %v1272_v12  ;;  %v1277_v42 = vld [vmem:[%s1628_s24 + $0x1d8] sm:$0x3f]  ;;  %v1315_v54 = vld [vmem:[%s1628_s24 + $0x68] sm:$0x3f] }
  0x50   : > { %541 = vrot.lane.b32.xlu1 %v1679_v49, %s1439_s25  ;;  %v813_v8 = vrot.slane %v789_v63, 1  ;;  %v816_v16 = vrot.slane %v792_v6, 1  ;;  %v815_v19 = vrot.slane %v791_v9, 1  ;;  %v793_v24 = vmax.f32 %v1270_v13, %v1271_v10  ;;  %v1316_v55 = vld [vmem:[%s1628_s24 + $0x70] sm:$0x3f] }
  0x51   : > { %539 = vrot.lane.b32.xlu0 %v1683_v52, %s1439_s25  ;;  %v1768_v7 = vmax.f32 %v787_v51, %v811_v62  ;;  %v1775_v15 = vmax.f32 %v790_v59, %v814_v4  ;;  %v818_v31 = vrot.slane %v794_v17, 1  ;;  %v796_v34 = vmax.f32 %v1274_v25, %v1275_v28  ;;  %v1314_v57 = vld [vmem:[%s1628_s24 + $0x60] sm:$0x3f]  ;;  %v1321_v25 = vld [vmem:[%s1628_s24 + $0xf8] sm:$0x3f] }
  0x52   : > { %v1779_v18 = vmax.f32 %v789_v63, %v813_v8  ;;  %v1786_v30 = vmax.f32 %v792_v6, %v816_v16  ;;  %v1790_v36 = vmax.f32 %v791_v9, %v815_v19  ;;  %v817_v38 = vrot.slane %v793_v24, 1  ;;  %v1318_v6 = vld [vmem:[%s1628_s24 + $0xe0] sm:$0x3f]  ;;  %v1319_v8 = vld [vmem:[%s1628_s24 + $0xe8] sm:$0x3f] }
  0x53   : > { %v795_v39 = vmax.f32 %v1272_v12, %v1273_v29  ;;  %v1796_v44 = vmax.f32 %v794_v17, %v818_v31  ;;  %v820_v46 = vrot.slane %v796_v34, 1  ;;  %v798_v47 = vmax.f32 %v1276_v41, %v1277_v42  ;;  %v1317_v9 = vld [vmem:[%s1628_s24 + $0x78] sm:$0x3f]  ;;  %v1324_v42 = vld [vmem:[%s1628_s24 + $0x170] sm:$0x3f] }
  0x54   : > { %545 = vrot.lane.b32.xlu1 %v1690_v58, %s1439_s25  ;;  %v1800_v50 = vmax.f32 %v793_v24, %v817_v38  ;;  %v797_v53 = vmax.f32 %v1275_v28, %v1276_v41  ;;  %v974_v63 = vmax.f32 %v1315_v54, %v1316_v55  ;;  %v973_v4 = vmax.f32 %v1314_v57, %v1315_v54  ;;  %v1320_v24 = vld [vmem:[%s1628_s24 + $0xf0] sm:$0x3f]  ;;  %v1323_v41 = vld [vmem:[%s1628_s24 + $0x168] sm:$0x3f] }
  0x55   : > { %543 = vrot.lane.b32.xlu0 %v1694_v61, %s1439_s25  ;;  %v819_v51 = vrot.slane %v795_v39, 1  ;;  %v1807_v59 = vmax.f32 %v796_v34, %v820_v46  ;;  %v822_v62 = vrot.slane %v798_v47, 1  ;;  %v976_v13 = vmax.f32 %v1318_v6, %v1319_v8  ;;  %v1322_v46 = vld [vmem:[%s1628_s24 + $0x160] sm:$0x3f] }
  0x56   : > { %v821_v1 = vrot.slane %v797_v53, 1  ;;  %v998_v12 = vrot.slane %v974_v63, 1  ;;  %v997_v17 = vrot.slane %v973_v4, 1  ;;  %v975_v19 = vmax.f32 %v1316_v55, %v1317_v9 }
  0x57   : > { %v1811_v0 = vmax.f32 %v795_v39, %v819_v51  ;;  %v1818_v10 = vmax.f32 %v798_v47, %v822_v62  ;;  %v1000_v29 = vrot.slane %v976_v13, 1  ;;  %v978_v31 = vmax.f32 %v1320_v24, %v1321_v25  ;;  %v1326_v62 = vld [vmem:[%s1628_s24 + $0x1e0] sm:$0x3f] }
  0x58   : > { %675 = vrot.lane.b32.xlu1 %v1700_v2, %s1439_s25  ;;  %v1822_v16 = vmax.f32 %v797_v53, %v821_v1  ;;  %v1828_v28 = vmax.f32 %v974_v63, %v998_v12  ;;  %v1832_v34 = vmax.f32 %v973_v4, %v997_v17  ;;  %v999_v38 = vrot.slane %v975_v19, 1  ;;  %v1327_v63 = vld [vmem:[%s1628_s24 + $0x1e8] sm:$0x3f]  ;;  %v1325_v1 = vld [vmem:[%s1628_s24 + $0x178] sm:$0x3f] }
  0x59   : > { %673 = vrot.lane.b32.xlu0 %v1704_v5, %s1439_s25  ;;  %v977_v39 = vmax.f32 %v1319_v8, %v1320_v24  ;;  %v1839_v47 = vmax.f32 %v976_v13, %v1000_v29  ;;  %v1002_v51 = vrot.slane %v978_v31, 1  ;;  %v980_v53 = vmax.f32 %v1323_v41, %v1324_v42  ;;  %v1328_v17 = vld [vmem:[%s1628_s24 + $0x1f0] sm:$0x3f] }
  0x5a   : > { %v1843_v54 = vmax.f32 %v975_v19, %v999_v38  ;;  %v979_v57 = vmax.f32 %v1322_v46, %v1323_v41  ;;  %v982_v8 = vmax.f32 %v1326_v62, %v1327_v63  ;;  %v981_v13 = vmax.f32 %v1324_v42, %v1325_v1  ;;  %v1329_v19 = vld [vmem:[%s1628_s24 + $0x1f8] sm:$0x3f] }
  0x5b   : > { %v1001_v55 = vrot.slane %v977_v39, 1  ;;  %v1850_v4 = vmax.f32 %v978_v31, %v1002_v51  ;;  %v1004_v6 = vrot.slane %v980_v53, 1  ;;  %v984_v29 = vmax.f32 %v1328_v17, %v1329_v19 }
  0x5c   : > { %679 = vrot.lane.b32.xlu1 %v1711_v11, %s1439_s25  ;;  %v1003_v12 = vrot.slane %v979_v57, 1  ;;  %v1006_v25 = vrot.slane %v982_v8, 1  ;;  %v1005_v38 = vrot.slane %v981_v13, 1 }
  0x5d   : > { %677 = vrot.lane.b32.xlu0 %v1715_v14, %s1439_s25  ;;  %v1854_v9 = vmax.f32 %v977_v39, %v1001_v55  ;;  %v1860_v24 = vmax.f32 %v980_v53, %v1004_v6  ;;  %v983_v39 = vmax.f32 %v1327_v63, %v1328_v17  ;;  %v1008_v42 = vrot.slane %v984_v29, 1 }
  0x5e   : > { %v1864_v31 = vmax.f32 %v979_v57, %v1003_v12  ;;  %v1868_v41 = vmax.f32 %v982_v8, %v1006_v25  ;;  %v1872_v46 = vmax.f32 %v981_v13, %v1005_v38 }
  0x5f   : > { %v1007_v51 = vrot.slane %v983_v39, 1  ;;  %v1876_v53 = vmax.f32 %v984_v29, %v1008_v42 }
  0x60   : > { %683 = vrot.lane.b32.xlu1 %v1722_v21, %s1439_s25 }
  0x61   : > { %681 = vrot.lane.b32.xlu0 %v1726_v27, %s1439_s25  ;;  %v1880_v55 = vmax.f32 %v983_v39, %v1007_v51 }
  0x64   : > { %687 = vrot.lane.b32.xlu1 %v1732_v33, %s1439_s25 }
  0x65   : > { %685 = vrot.lane.b32.xlu0 %v1736_v37, %s1439_s25 }
  0x68   : > { %691 = vrot.lane.b32.xlu1 %v1743_v45, %s1439_s25 }
  0x69   : > { %689 = vrot.lane.b32.xlu0 %v1747_v48, %s1439_s25 }
  0x6c   : > { %695 = vrot.lane.b32.xlu1 %v1754_v56, %s1439_s25 }
  0x6d   : > { %693 = vrot.lane.b32.xlu0 %v1758_v60, %s1439_s25 }
  0x70   : > { %861 = vrot.lane.b32.xlu1 %v1764_v3, %s1439_s25 }
  0x71   : > { %859 = vrot.lane.b32.xlu0 %v1768_v7, %s1439_s25 }
  0x74   : > { %865 = vrot.lane.b32.xlu1 %v1775_v15, %s1439_s25 }
  0x75   : > { %863 = vrot.lane.b32.xlu0 %v1779_v18, %s1439_s25 }
  0x78   : > { %869 = vrot.lane.b32.xlu1 %v1786_v30, %s1439_s25 }
  0x79   : > { %867 = vrot.lane.b32.xlu0 %v1790_v36, %s1439_s25 }
  0x7c   : > { %873 = vrot.lane.b32.xlu1 %v1796_v44, %s1439_s25 }
  0x7d   : > { %871 = vrot.lane.b32.xlu0 %v1800_v50, %s1439_s25 }
  0x80   : > { %877 = vrot.lane.b32.xlu1 %v1807_v59, %s1439_s25 }
  0x81   : > { %875 = vrot.lane.b32.xlu0 %v1811_v0, %s1439_s25 }
  0x84   : > { %881 = vrot.lane.b32.xlu1 %v1818_v10, %s1439_s25 }
  0x85   : > { %879 = vrot.lane.b32.xlu0 %v1822_v16, %s1439_s25 }
  0x88   : > { %1047 = vrot.lane.b32.xlu1 %v1828_v28, %s1439_s25 }
  0x89   : > { %1045 = vrot.lane.b32.xlu0 %v1832_v34, %s1439_s25 }
  0x8c   : > { %1051 = vrot.lane.b32.xlu1 %v1839_v47, %s1439_s25 }
  0x8d   : > { %1049 = vrot.lane.b32.xlu0 %v1843_v54, %s1439_s25 }
  0x90   : > { %1055 = vrot.lane.b32.xlu1 %v1850_v4, %s1439_s25 }
  0x91   : > { %1053 = vrot.lane.b32.xlu0 %v1854_v9, %s1439_s25 }
  0x94   : > { %1059 = vrot.lane.b32.xlu1 %v1860_v24, %s1439_s25 }
  0x95   : > { %1057 = vrot.lane.b32.xlu0 %v1864_v31, %s1439_s25 }
  0x98   : > { %1063 = vrot.lane.b32.xlu1 %v1868_v41, %s1439_s25 }
  0x99   : > { %1061 = vrot.lane.b32.xlu0 %v1872_v46, %s1439_s25 }
  0x9c   : > { %1067 = vrot.lane.b32.xlu1 %v1876_v53, %s1439_s25 }
  0x9d   : > { %1065 = vrot.lane.b32.xlu0 %v1880_v55, %s1439_s25 }
  0xb2   : > { %v528_v57 = vpop.permute.xlu1 %527 }
  0xb3   : > { %v561_v62 = vmax.f32 %v1640_v20, %v528_v57  ;;  %v524_v63 = vpop.permute.xlu0 %523 }
  0xb4   : > { %v559_v1 = vmax.f32 %v1643_v22, %v524_v63 }
  0xb5   : > { %574 = vst.msk [vmem:[%s1891_s29 + $0x8] sm:$0x7] %vm571_vm0, %v561_v62 }
  0xb6   : > { %572 = vst.msk [vmem:[%s1891_s29] sm:$0x7] %vm571_vm0, %v559_v1  ;;  %v530_v6 = vpop.permute.xlu1 %529 }
  0xb7   : > { %v562_v8 = vmax.f32 %v1647_v23, %v530_v6  ;;  %v526_v12 = vpop.permute.xlu0 %525 }
  0xb8   : > { %v560_v13 = vmax.f32 %v1651_v26, %v526_v12 }
  0xb9   : > { %575 = vst.msk [vmem:[%s1891_s29 + $0x24] sm:$0x7] %vm571_vm0, %v562_v8 }
  0xba   : > { %573 = vst.msk [vmem:[%s1891_s29 + $0x4] sm:$0x7] %vm571_vm0, %v560_v13  ;;  %v534_v20 = vpop.permute.xlu1 %533 }
  0xbb   : > { %v564_v22 = vmax.f32 %v1658_v32, %v534_v20  ;;  %v532_v17 = vpop.permute.xlu0 %531 }
  0xbc   : > { %v563_v19 = vmax.f32 %v1662_v35, %v532_v17  ;;  %v736_v20 = vld [vmem:[%s1891_s29 + $0x8] sm:$0x7] }
  0xbd   : > { %577 = vst.msk [vmem:[%s1891_s29 + $0x2c] sm:$0x7] %vm571_vm0, %v564_v22 }
  0xbe   : > { %576 = vst.msk [vmem:[%s1891_s29 + $0x28] sm:$0x7] %vm571_vm0, %v563_v19  ;;  %v538_v23 = vpop.permute.xlu1 %537 }
  0xbf   : > { %v566_v26 = vmax.f32 %v1668_v40, %v538_v23  ;;  %v536_v25 = vpop.permute.xlu0 %535 }
  0xc0   : > { %v565_v29 = vmax.f32 %v1672_v43, %v536_v25 }
  0xc1   : > { %579 = vst.msk [vmem:[%s1891_s29 + $0x4c] sm:$0x7] %vm571_vm0, %v566_v26  ;;  %v735_v62 = vld [vmem:[%s1891_s29 + $0x4] sm:$0x7] }
  0xc2   : > { %578 = vst.msk [vmem:[%s1891_s29 + $0x48] sm:$0x7] %vm571_vm0, %v565_v29  ;;  %v542_v32 = vpop.permute.xlu1 %541 }
  0xc3   : > { %v568_v35 = vmax.f32 %v1679_v49, %v542_v32  ;;  %v540_v38 = vpop.permute.xlu0 %539 }
  0xc4   : > { %v567_v39 = vmax.f32 %v1683_v52, %v540_v38 }
  0xc5   : > { %581 = vst.msk [vmem:[%s1891_s29 + $0x6c] sm:$0x7] %vm571_vm0, %v568_v35  ;;  %v738_v25 = vld [vmem:[%s1891_s29 + $0x28] sm:$0x7] }
  0xc6   : > { %580 = vst.msk [vmem:[%s1891_s29 + $0x50] sm:$0x7] %vm571_vm0, %v567_v39  ;;  %v546_v40 = vpop.permute.xlu1 %545 }
  0xc7   : > { %v570_v43 = vmax.f32 %v1690_v58, %v546_v40  ;;  %v544_v42 = vpop.permute.xlu0 %543 }
  0xc8   : > { %v569_v51 = vmax.f32 %v1694_v61, %v544_v42  ;;  %v734_v61 = vld [vmem:[%s1891_s29] sm:$0x7] }
  0xc9   : > { %583 = vst.msk [vmem:[%s1891_s29 + $0x74] sm:$0x7] %vm571_vm0, %v570_v43  ;;  %v740_v40 = vld [vmem:[%s1891_s29 + $0x48] sm:$0x7] }
  0xca   : > { %582 = vst.msk [vmem:[%s1891_s29 + $0x70] sm:$0x7] %vm571_vm0, %v569_v51  ;;  %v676_v49 = vpop.permute.xlu1 %675 }
  0xcb   : > { %v710_v52 = vmax.f32 %v1700_v2, %v676_v49  ;;  %v674_v57 = vpop.permute.xlu0 %673 }
  0xcc   : > { %v709_v63 = vmax.f32 %v1704_v5, %v674_v57  ;;  %v737_v5 = vld [vmem:[%s1891_s29 + $0x24] sm:$0x7] }
  0xcd   : > { %1251 = vst.msk [vmem:[%s1891_s29 + $0x10] sm:$0x7] %vm571_vm0, %v710_v52  ;;  %v747_v58 = vmax.f32 %v735_v62, %v710_v52  ;;  %v742_v57 = vld [vmem:[%s1891_s29 + $0x50] sm:$0x7] }
  0xce   : > { %1250 = vst.msk [vmem:[%s1891_s29 + $0xc] sm:$0x7] %vm571_vm0, %v709_v63  ;;  %v746_v1 = vmax.f32 %v734_v61, %v709_v63  ;;  %v680_v6 = vpop.permute.xlu1 %679 }
  0xcf   : > { %759 = vst.msk [vmem:[%s1891_s29 + $0x4] sm:$0x7] %vm571_vm0, %v747_v58  ;;  %v712_v2 = vmax.f32 %v1711_v11, %v680_v6  ;;  %v678_v8 = vpop.permute.xlu0 %677 }
  0xd0   : > { %758 = vst.msk [vmem:[%s1891_s29] sm:$0x7] %vm571_vm0, %v746_v1  ;;  %v711_v12 = vmax.f32 %v1715_v14, %v678_v8  ;;  %v739_v14 = vld [vmem:[%s1891_s29 + $0x2c] sm:$0x7] }
  0xd1   : > { %1253 = vst.msk [vmem:[%s1891_s29 + $0x30] sm:$0x7] %vm571_vm0, %v712_v2  ;;  %v749_v13 = vmax.f32 %v737_v5, %v712_v2  ;;  %v744_v6 = vld [vmem:[%s1891_s29 + $0x70] sm:$0x7] }
  0xd2   : > { %1252 = vst.msk [vmem:[%s1891_s29 + $0x14] sm:$0x7] %vm571_vm0, %v711_v12  ;;  %v748_v22 = vmax.f32 %v736_v20, %v711_v12  ;;  %v684_v17 = vpop.permute.xlu1 %683 }
  0xd3   : > { %761 = vst.msk [vmem:[%s1891_s29 + $0x24] sm:$0x7] %vm571_vm0, %v749_v13  ;;  %v714_v11 = vmax.f32 %v1722_v21, %v684_v17  ;;  %v682_v19 = vpop.permute.xlu0 %681 }
  0xd4   : > { %760 = vst.msk [vmem:[%s1891_s29 + $0x8] sm:$0x7] %vm571_vm0, %v748_v22  ;;  %v713_v23 = vmax.f32 %v1726_v27, %v682_v19  ;;  %v741_v27 = vld [vmem:[%s1891_s29 + $0x4c] sm:$0x7] }
  0xd5   : > { %1255 = vst.msk [vmem:[%s1891_s29 + $0x38] sm:$0x7] %vm571_vm0, %v714_v11  ;;  %v751_v26 = vmax.f32 %v739_v14, %v714_v11  ;;  %v1290_v20 = vld [vmem:[%s1891_s29 + $0xc] sm:$0x7] }
  0xd6   : > { %1254 = vst.msk [vmem:[%s1891_s29 + $0x34] sm:$0x7] %vm571_vm0, %v713_v23  ;;  %v750_v29 = vmax.f32 %v738_v25, %v713_v23  ;;  %v688_v32 = vpop.permute.xlu1 %687 }
  0xd7   : > { %763 = vst.msk [vmem:[%s1891_s29 + $0x2c] sm:$0x7] %vm571_vm0, %v751_v26  ;;  %v716_v21 = vmax.f32 %v1732_v33, %v688_v32  ;;  %v686_v35 = vpop.permute.xlu0 %685 }
  0xd8   : > { %762 = vst.msk [vmem:[%s1891_s29 + $0x28] sm:$0x7] %vm571_vm0, %v750_v29  ;;  %v715_v38 = vmax.f32 %v1736_v37, %v686_v35  ;;  %v743_v37 = vld [vmem:[%s1891_s29 + $0x6c] sm:$0x7] }
  0xd9   : > { %1257 = vst.msk [vmem:[%s1891_s29 + $0x58] sm:$0x7] %vm571_vm0, %v716_v21  ;;  %v753_v39 = vmax.f32 %v741_v27, %v716_v21  ;;  %v1292_v23 = vld [vmem:[%s1891_s29 + $0x14] sm:$0x7] }
  0xda   : > { %1256 = vst.msk [vmem:[%s1891_s29 + $0x54] sm:$0x7] %vm571_vm0, %v715_v38  ;;  %v752_v43 = vmax.f32 %v740_v40, %v715_v38  ;;  %v692_v42 = vpop.permute.xlu1 %691 }
  0xdb   : > { %765 = vst.msk [vmem:[%s1891_s29 + $0x4c] sm:$0x7] %vm571_vm0, %v753_v39  ;;  %v718_v33 = vmax.f32 %v1743_v45, %v692_v42  ;;  %v690_v51 = vpop.permute.xlu0 %689 }
  0xdc   : > { %764 = vst.msk [vmem:[%s1891_s29 + $0x48] sm:$0x7] %vm571_vm0, %v752_v43  ;;  %v717_v49 = vmax.f32 %v1747_v48, %v690_v51  ;;  %v745_v48 = vld [vmem:[%s1891_s29 + $0x74] sm:$0x7] }
  0xdd   : > { %1259 = vst.msk [vmem:[%s1891_s29 + $0x78] sm:$0x7] %vm571_vm0, %v718_v33  ;;  %v755_v52 = vmax.f32 %v743_v37, %v718_v33  ;;  %v1294_v35 = vld [vmem:[%s1891_s29 + $0x34] sm:$0x7] }
  0xde   : > { %1258 = vst.msk [vmem:[%s1891_s29 + $0x5c] sm:$0x7] %vm571_vm0, %v717_v49  ;;  %v754_v62 = vmax.f32 %v742_v57, %v717_v49  ;;  %v696_v63 = vpop.permute.xlu1 %695 }
  0xdf   : > { %767 = vst.msk [vmem:[%s1891_s29 + $0x6c] sm:$0x7] %vm571_vm0, %v755_v52  ;;  %v720_v45 = vmax.f32 %v1754_v56, %v696_v63  ;;  %v694_v58 = vpop.permute.xlu0 %693 }
  0xe0   : > { %766 = vst.msk [vmem:[%s1891_s29 + $0x50] sm:$0x7] %vm571_vm0, %v754_v62  ;;  %v719_v61 = vmax.f32 %v1758_v60, %v694_v58  ;;  %v1291_v60 = vld [vmem:[%s1891_s29 + $0x10] sm:$0x7] }
  0xe1   : > { %1261 = vst.msk [vmem:[%s1891_s29 + $0x80] sm:$0x7] %vm571_vm0, %v720_v45  ;;  %v757_v1 = vmax.f32 %v745_v48, %v720_v45  ;;  %v1296_v42 = vld [vmem:[%s1891_s29 + $0x54] sm:$0x7] }
  0xe2   : > { %1260 = vst.msk [vmem:[%s1891_s29 + $0x7c] sm:$0x7] %vm571_vm0, %v719_v61  ;;  %v756_v2 = vmax.f32 %v744_v6, %v719_v61  ;;  %v862_v8 = vpop.permute.xlu1 %861 }
  0xe3   : > { %769 = vst.msk [vmem:[%s1891_s29 + $0x74] sm:$0x7] %vm571_vm0, %v757_v1  ;;  %v896_v56 = vmax.f32 %v1764_v3, %v862_v8  ;;  %v860_v5 = vpop.permute.xlu0 %859 }
  0xe4   : > { %768 = vst.msk [vmem:[%s1891_s29 + $0x70] sm:$0x7] %vm571_vm0, %v756_v2  ;;  %v895_v12 = vmax.f32 %v1768_v7, %v860_v5  ;;  %v1293_v7 = vld [vmem:[%s1891_s29 + $0x30] sm:$0x7] }
  0xe5   : > { %1279 = vst.msk [vmem:[%s1891_s29 + $0x1c] sm:$0x7] %vm571_vm0, %v896_v56  ;;  %v933_v13 = vmax.f32 %v1291_v60, %v896_v56  ;;  %v1298_v57 = vld [vmem:[%s1891_s29 + $0x5c] sm:$0x7] }
  0xe6   : > { %1278 = vst.msk [vmem:[%s1891_s29 + $0x18] sm:$0x7] %vm571_vm0, %v895_v12  ;;  %v932_v22 = vmax.f32 %v1290_v20, %v895_v12  ;;  %v866_v17 = vpop.permute.xlu1 %865 }
  0xe7   : > { %1303 = vst.msk [vmem:[%s1891_s29 + $0x10] sm:$0x7] %vm571_vm0, %v933_v13  ;;  %v898_v3 = vmax.f32 %v1775_v15, %v866_v17  ;;  %v864_v11 = vpop.permute.xlu0 %863 }
  0xe8   : > { %1302 = vst.msk [vmem:[%s1891_s29 + $0xc] sm:$0x7] %vm571_vm0, %v932_v22  ;;  %v897_v19 = vmax.f32 %v1779_v18, %v864_v11  ;;  %v1295_v18 = vld [vmem:[%s1891_s29 + $0x38] sm:$0x7] }
  0xe9   : > { %1281 = vst.msk [vmem:[%s1891_s29 + $0x3c] sm:$0x7] %vm571_vm0, %v898_v3  ;;  %v935_v14 = vmax.f32 %v1293_v7, %v898_v3  ;;  %v1300_v61 = vld [vmem:[%s1891_s29 + $0x7c] sm:$0x7] }
  0xea   : > { %1280 = vst.msk [vmem:[%s1891_s29 + $0x20] sm:$0x7] %vm571_vm0, %v897_v19  ;;  %v934_v26 = vmax.f32 %v1292_v23, %v897_v19  ;;  %v870_v25 = vpop.permute.xlu1 %869 }
  0xeb   : > { %1305 = vst.msk [vmem:[%s1891_s29 + $0x30] sm:$0x7] %vm571_vm0, %v935_v14  ;;  %v900_v15 = vmax.f32 %v1786_v30, %v870_v25  ;;  %v868_v29 = vpop.permute.xlu0 %867 }
  0xec   : > { %1304 = vst.msk [vmem:[%s1891_s29 + $0x14] sm:$0x7] %vm571_vm0, %v934_v26  ;;  %v899_v32 = vmax.f32 %v1790_v36, %v868_v29  ;;  %v1297_v36 = vld [vmem:[%s1891_s29 + $0x58] sm:$0x7] }
  0xed   : > { %1283 = vst.msk [vmem:[%s1891_s29 + $0x44] sm:$0x7] %vm571_vm0, %v900_v15  ;;  %v937_v21 = vmax.f32 %v1295_v18, %v900_v15  ;;  %v1330_v5 = vld [vmem:[%s1891_s29 + $0x18] sm:$0x7] }
  0xee   : > { %1282 = vst.msk [vmem:[%s1891_s29 + $0x40] sm:$0x7] %vm571_vm0, %v899_v32  ;;  %v936_v27 = vmax.f32 %v1294_v35, %v899_v32  ;;  %v874_v38 = vpop.permute.xlu1 %873 }
  0xef   : > { %1307 = vst.msk [vmem:[%s1891_s29 + $0x38] sm:$0x7] %vm571_vm0, %v937_v21  ;;  %v902_v30 = vmax.f32 %v1796_v44, %v874_v38  ;;  %v872_v39 = vpop.permute.xlu0 %871 }
  0xf0   : > { %1306 = vst.msk [vmem:[%s1891_s29 + $0x34] sm:$0x7] %vm571_vm0, %v936_v27  ;;  %v901_v40 = vmax.f32 %v1800_v50, %v872_v39  ;;  %v1299_v50 = vld [vmem:[%s1891_s29 + $0x78] sm:$0x7]  ;;  %v1333_v20 = vld [vmem:[%s1891_s29 + $0x3c] sm:$0x7] }
  0xf1   : > { %1285 = vst.msk [vmem:[%s1891_s29 + $0x64] sm:$0x7] %vm571_vm0, %v902_v30  ;;  %v939_v43 = vmax.f32 %v1297_v36, %v902_v30 }
  0xf2   : > { %1284 = vst.msk [vmem:[%s1891_s29 + $0x60] sm:$0x7] %vm571_vm0, %v901_v40  ;;  %v938_v33 = vmax.f32 %v1296_v42, %v901_v40  ;;  %v878_v51 = vpop.permute.xlu1 %877 }
  0xf3   : > { %1309 = vst.msk [vmem:[%s1891_s29 + $0x58] sm:$0x7] %vm571_vm0, %v939_v43  ;;  %v904_v44 = vmax.f32 %v1807_v59, %v878_v51  ;;  %v876_v37 = vpop.permute.xlu0 %875 }
  0xf4   : > { %1308 = vst.msk [vmem:[%s1891_s29 + $0x54] sm:$0x7] %vm571_vm0, %v938_v33  ;;  %v903_v49 = vmax.f32 %v1811_v0, %v876_v37  ;;  %v1301_v0 = vld [vmem:[%s1891_s29 + $0x80] sm:$0x7]  ;;  %v1335_v19 = vld [vmem:[%s1891_s29 + $0x44] sm:$0x7] }
  0xf5   : > { %1287 = vst.msk [vmem:[%s1891_s29 + $0x84] sm:$0x7] %vm571_vm0, %v904_v44  ;;  %v941_v52 = vmax.f32 %v1299_v50, %v904_v44 }
  0xf6   : > { %1286 = vst.msk [vmem:[%s1891_s29 + $0x68] sm:$0x7] %vm571_vm0, %v903_v49  ;;  %v940_v62 = vmax.f32 %v1298_v57, %v903_v49  ;;  %v882_v63 = vpop.permute.xlu1 %881 }
  0xf7   : > { %1311 = vst.msk [vmem:[%s1891_s29 + $0x78] sm:$0x7] %vm571_vm0, %v941_v52  ;;  %v906_v59 = vmax.f32 %v1818_v10, %v882_v63  ;;  %v880_v45 = vpop.permute.xlu0 %879 }
  0xf8   : > { %1310 = vst.msk [vmem:[%s1891_s29 + $0x5c] sm:$0x7] %vm571_vm0, %v940_v62  ;;  %v905_v58 = vmax.f32 %v1822_v16, %v880_v45  ;;  %v1331_v16 = vld [vmem:[%s1891_s29 + $0x1c] sm:$0x7]  ;;  %v1337_v29 = vld [vmem:[%s1891_s29 + $0x64] sm:$0x7] }
  0xf9   : > { %1289 = vst.msk [vmem:[%s1891_s29 + $0x8c] sm:$0x7] %vm571_vm0, %v906_v59  ;;  %v943_v48 = vmax.f32 %v1301_v0, %v906_v59 }
  0xfa   : > { %1288 = vst.msk [vmem:[%s1891_s29 + $0x88] sm:$0x7] %vm571_vm0, %v905_v58  ;;  %v942_v1 = vmax.f32 %v1300_v61, %v905_v58  ;;  %v1048_v6 = vpop.permute.xlu1 %1047 }
  0xfb   : > { %1313 = vst.msk [vmem:[%s1891_s29 + $0x80] sm:$0x7] %vm571_vm0, %v943_v48  ;;  %v1082_v10 = vmax.f32 %v1828_v28, %v1048_v6  ;;  %v1046_v2 = vpop.permute.xlu0 %1045 }
  0xfc   : > { %1312 = vst.msk [vmem:[%s1891_s29 + $0x7c] sm:$0x7] %vm571_vm0, %v942_v1  ;;  %v1081_v8 = vmax.f32 %v1832_v34, %v1046_v2  ;;  %v1332_v34 = vld [vmem:[%s1891_s29 + $0x20] sm:$0x7]  ;;  %v1339_v38 = vld [vmem:[%s1891_s29 + $0x84] sm:$0x7] }
  0xfd   : > { %v1106_v56 = vmax.f32 %v1331_v16, %v1082_v10  ;;  %v1338_v39 = vld [vmem:[%s1891_s29 + $0x68] sm:$0x7] }
  0xfe   : > { %v1105_v60 = vmax.f32 %v1330_v5, %v1081_v8  ;;  %v1052_v12 = vpop.permute.xlu1 %1051 }
  0xff   : > { %1343 = vst.msk [vmem:[%s1891_s29 + $0x1c] sm:$0x7] %vm571_vm0, %v1106_v56  ;;  %v1084_v13 = vmax.f32 %v1839_v47, %v1052_v12  ;;  %v1050_v28 = vpop.permute.xlu0 %1049 }
 0x100   : > { %1342 = vst.msk [vmem:[%s1891_s29 + $0x18] sm:$0x7] %vm571_vm0, %v1105_v60  ;;  %v1083_v22 = vmax.f32 %v1843_v54, %v1050_v28  ;;  %v1334_v54 = vld [vmem:[%s1891_s29 + $0x40] sm:$0x7] }
 0x101   : > { %v1108_v17 = vmax.f32 %v1333_v20, %v1084_v13  ;;  %v1340_v44 = vld [vmem:[%s1891_s29 + $0x88] sm:$0x7] }
 0x102   : > { %v1107_v3 = vmax.f32 %v1332_v34, %v1083_v22  ;;  %v1056_v11 = vpop.permute.xlu1 %1055 }
 0x103   : > { %1345 = vst.msk [vmem:[%s1891_s29 + $0x3c] sm:$0x7] %vm571_vm0, %v1108_v17  ;;  %v1086_v7 = vmax.f32 %v1850_v4, %v1056_v11  ;;  %v1054_v47 = vpop.permute.xlu0 %1053 }
 0x104   : > { %1344 = vst.msk [vmem:[%s1891_s29 + $0x20] sm:$0x7] %vm571_vm0, %v1107_v3  ;;  %v1085_v14 = vmax.f32 %v1854_v9, %v1054_v47  ;;  %v1336_v9 = vld [vmem:[%s1891_s29 + $0x60] sm:$0x7] }
 0x105   : > { %v1110_v23 = vmax.f32 %v1335_v19, %v1086_v7 }
 0x106   : > { %v1109_v26 = vmax.f32 %v1334_v54, %v1085_v14  ;;  %v1060_v25 = vpop.permute.xlu1 %1059 }
 0x107   : > { %1347 = vst.msk [vmem:[%s1891_s29 + $0x44] sm:$0x7] %vm571_vm0, %v1110_v23  ;;  %v1088_v15 = vmax.f32 %v1860_v24, %v1060_v25  ;;  %v1058_v4 = vpop.permute.xlu0 %1057 }
 0x108   : > { %1346 = vst.msk [vmem:[%s1891_s29 + $0x40] sm:$0x7] %vm571_vm0, %v1109_v26  ;;  %v1087_v18 = vmax.f32 %v1864_v31, %v1058_v4 }
 0x109   : > { %v1112_v32 = vmax.f32 %v1337_v29, %v1088_v15 }
 0x10a   : > { %v1111_v21 = vmax.f32 %v1336_v9, %v1087_v18  ;;  %v1064_v35 = vpop.permute.xlu1 %1063 }
 0x10b   : > { %1349 = vst.msk [vmem:[%s1891_s29 + $0x64] sm:$0x7] %vm571_vm0, %v1112_v32  ;;  %v1090_v27 = vmax.f32 %v1868_v41, %v1064_v35  ;;  %v1062_v24 = vpop.permute.xlu0 %1061  ;;  %v1341_v41 = vld [vmem:[%s1891_s29 + $0x8c] sm:$0x7] }
 0x10c   : > { %1348 = vst.msk [vmem:[%s1891_s29 + $0x60] sm:$0x7] %vm571_vm0, %v1111_v21  ;;  %v1089_v30 = vmax.f32 %v1872_v46, %v1062_v24 }
 0x10d   : > { %v1114_v31 = vmax.f32 %v1339_v38, %v1090_v27 }
 0x10e   : > { %v1113_v36 = vmax.f32 %v1338_v39, %v1089_v30  ;;  %v1068_v40 = vpop.permute.xlu1 %1067 }
 0x10f   : > { %1351 = vst.msk [vmem:[%s1891_s29 + $0x84] sm:$0x7] %vm571_vm0, %v1114_v31  ;;  %v1092_v43 = vmax.f32 %v1876_v53, %v1068_v40  ;;  %v1066_v42 = vpop.permute.xlu0 %1065 }
 0x110   : > { %1350 = vst.msk [vmem:[%s1891_s29 + $0x68] sm:$0x7] %vm571_vm0, %v1113_v36  ;;  %v1091_v33 = vmax.f32 %v1880_v55, %v1066_v42 }
 0x111   : > { %v1116_v51 = vmax.f32 %v1341_v41, %v1092_v43 }
 0x112   : > { %v1115_v37 = vmax.f32 %v1340_v44, %v1091_v33 }
 0x113   : > { %1353 = vst.msk [vmem:[%s1891_s29 + $0x8c] sm:$0x7] %vm571_vm0, %v1116_v51 }
 0x114   : > { %1352 = vst.msk [vmem:[%s1891_s29 + $0x88] sm:$0x7] %vm571_vm0, %v1115_v37 }
 0x115 PF: > { %s11_s10 = sadd.s32 1, %s1437_s10   ;;  %s2138_s6 = smov %s1425_s7 }
 0x116   : > { %p8_p10 = scmp.ge.s32.totalorder %s11_s10, 4   ;;  %s2139_s7 = smov %s1485_s14 }
 0x117   : > { %s2140_s8 = smov %s1433_s9  ;;  %s2141_s9 = smov %s2143_s11 }
 0x118   :  { %10 = sbr.rel (!%p8_p10) target bundleno = 3 (0x3), region = 102 }

</bundles_post_ra>
